<compile_context>
chip_gen: v7x
topology: tpu7x:2x2x1
jax: 0.10.0
libtpu: 0.0.40
codegen_flags: <defaults>
</compile_context>

<pallas_src>
import functools

import jax
import jax.numpy as jnp
from jax.experimental import pallas as pl
from jax.experimental.pallas import tpu as pltpu


def mha_kernel(xq_ref, xk_ref, xv_ref, mask_ref,
               wq_ref, wk_ref, wv_ref, wo_ref, ln_ref,
               out_ref, attn_ref, *,
               n_heads, d_k, d_v, eps, compute_dtype):
    f32 = jnp.float32
    cd = compute_dtype
    H = n_heads
    B, L, D = xq_ref.shape
    G = H * B                       # merged (head, batch) batch dimension

    xq = xq_ref[...]                # (B, L, D), dtype == compute_dtype
    xk = xk_ref[...]
    xv = xv_ref[...]

    # ---- head-batched projections: ONE dot_general per projection over the
    #      merged (head, batch) batch dim.  The broadcasts/reshapes below only
    #      add/merge leading dims (minor two dims untouched) -> no relayout.
    def expand_x(x):                # (B, L, D) -> (G, L, D), g = h*B + b
        return jnp.broadcast_to(x[None], (H, B, L, D)).reshape(G, L, D)

    def expand_w(w):                # (H, i, o) -> (G, i, o), g = h*B + b
        return jnp.broadcast_to(w[:, None], (H, B) + w.shape[1:]).reshape(
            (G,) + w.shape[1:])

    q = jnp.einsum('gld,gdk->glk', expand_x(xq), expand_w(wq_ref[...]),
                   preferred_element_type=f32)               # (G, L, d_k) f32
    k = jnp.einsum('gld,gdk->glk', expand_x(xk), expand_w(wk_ref[...]),
                   preferred_element_type=f32)               # (G, L, d_k)
    v = jnp.einsum('gld,gdk->glk', expand_x(xv), expand_w(wv_ref[...]),
                   preferred_element_type=f32)               # (G, L, d_v)

    # Fold the 1/sqrt(d_k) softmax scale into Q once (hoisted).
    q = q * jnp.float32(1.0 / (d_k ** 0.5))

    # ---- masked scores; mask bias computed once, broadcast over heads.
    bias = jnp.where(mask_ref[...] > 0.5, f32(-1e9), f32(0.0))   # (B, L, L)
    bias_g = jnp.broadcast_to(bias[None], (H, B, L, L)).reshape(G, L, L)

    scores = jnp.einsum('gqd,gkd->gqk', q.astype(cd), k.astype(cd),
                        preferred_element_type=f32) + bias_g     # (G, L, L)

    # ---- numerically-stable softmax; normalization on the EUP (approx rcp).
    m = jnp.max(scores, axis=-1, keepdims=True)
    e = jnp.exp(scores - m)
    p = e * pl.reciprocal(jnp.sum(e, axis=-1, keepdims=True), approx=True)

    # Single full-block store of all attention probabilities (no per-head
    # partial stores).  A fully lane-dense (B, H*L*L) slab would require a
    # sublane->lane relayout inside the kernel; at L=8 attn is 2 KiB, skip.
    attn_ref[...] = p.astype(attn_ref.dtype)

    # ---- context + output projection.  No jnp.concatenate: batched matmul
    #      against per-head fc slabs, then a cheap sum over the head axis.
    ctx = jnp.einsum('gqk,gkd->gqd', p.astype(cd), v.astype(cd),
                     preferred_element_type=f32)             # (G, L, d_v)
    o_g = jnp.einsum('glj,gjd->gld', ctx.astype(cd), expand_w(wo_ref[...]),
                     preferred_element_type=f32)             # (G, L, D)
    out_proj = jnp.sum(o_g.reshape(H, B, L, D), axis=0)      # (B, L, D)

    # ---- residual + LayerNorm (f32 vector math; correct on v5e too).
    y = out_proj + xq.astype(f32)
    mu = jnp.mean(y, axis=-1, keepdims=True)
    var = jnp.mean((y - mu) ** 2, axis=-1, keepdims=True)
    y = (y - mu) * jax.lax.rsqrt(var + eps)
    gamma = ln_ref[0:1, :].astype(f32)                       # (1, D)
    beta = ln_ref[1:2, :].astype(f32)
    out_ref[...] = (y * gamma + beta).astype(out_ref.dtype)


def multi_head_attention(input_Q, input_K, input_V, attn_mask,
                         w_q, w_k, w_v, w_o, gamma, beta,
                         *, n_heads, d_k, d_v, eps=1e-5,
                         compute_dtype=jnp.float32):
    """input_*: (B, L, D); attn_mask: (B, L, L) float, 1.0 = masked.
    Weights stored as (in_features, out_features): y = x @ W."""
    B, L, D = input_Q.shape
    H = n_heads
    G = H * B

    # Wrapper-side layout plumbing (free): per-head weight slabs so the kernel
    # runs head-batched dot_generals with no in-kernel transpose, and a single
    # (2, D) LayerNorm slab instead of two separate sub-(8,128) blocks.
    wq_h = w_q.reshape(D, H, d_k).transpose(1, 0, 2).astype(compute_dtype)
    wk_h = w_k.reshape(D, H, d_k).transpose(1, 0, 2).astype(compute_dtype)
    wv_h = w_v.reshape(D, H, d_v).transpose(1, 0, 2).astype(compute_dtype)
    wo_h = w_o.reshape(H, d_v, D).astype(compute_dtype)
    ln = jnp.concatenate([gamma, beta], axis=0).astype(jnp.float32)   # (2, D)

    xq = input_Q.astype(compute_dtype)
    xk = input_K.astype(compute_dtype)
    xv = input_V.astype(compute_dtype)
    mask = attn_mask.astype(jnp.float32)

    kernel = functools.partial(mha_kernel, n_heads=H, d_k=d_k, d_v=d_v,
                               eps=eps, compute_dtype=compute_dtype)

    out, attn_g = pl.pallas_call(
        kernel,
        out_shape=(jax.ShapeDtypeStruct((B, L, D), jnp.float32),
                   jax.ShapeDtypeStruct((G, L, L), jnp.float32)),
        # Whole problem fits one VMEM tile -> single grid step (a per-batch
        # grid paid ~0.35us/step for sub-us work).  At realistic L, add a
        # >=2-way "parallel" query-tile grid axis (flash-style, without
        # materializing full attn) so v7x's two TensorCores are used and the
        # attention block stays within its 64 MiB VMEM.
        grid=(1,),
        in_specs=[
            pl.BlockSpec((B, L, D), lambda i: (0, 0, 0)),      # input_Q
            pl.BlockSpec((B, L, D), lambda i: (0, 0, 0)),      # input_K
            pl.BlockSpec((B, L, D), lambda i: (0, 0, 0)),      # input_V
            pl.BlockSpec((B, L, L), lambda i: (0, 0, 0)),      # attn_mask
            pl.BlockSpec((H, D, d_k), lambda i: (0, 0, 0)),    # W_Q per head
            pl.BlockSpec((H, D, d_k), lambda i: (0, 0, 0)),    # W_K per head
            pl.BlockSpec((H, D, d_v), lambda i: (0, 0, 0)),    # W_V per head
            pl.BlockSpec((H, d_v, D), lambda i: (0, 0, 0)),    # fc per head
            pl.BlockSpec((2, D), lambda i: (0, 0)),            # LN gamma|beta
        ],
        out_specs=(pl.BlockSpec((B, L, D), lambda i: (0, 0, 0)),
                   pl.BlockSpec((G, L, L), lambda i: (0, 0, 0))),
        compiler_params=pltpu.CompilerParams(
            dimension_semantics=("arbitrary",)),
    )(xq, xk, xv, mask, wq_h, wk_h, wv_h, wo_h, ln)

    # (h, b, q, k) -> (b, h, q, k): wrapper-side layout plumbing only.
    attn = attn_g.reshape(H, B, L, L).transpose(1, 0, 2, 3)
    return out, attn


def reference_mha(xq, xk, xv, mask, wq, wk, wv, wo, gamma, beta,
                  *, n_heads, d_k, d_v, eps=1e-5):
    """Pure-JAX reference mirroring the PyTorch forward."""
    B, L, D = xq.shape
    Q = (xq @ wq).reshape(B, L, n_heads, d_k).transpose(0, 2, 1, 3)
    K = (xk @ wk).reshape(B, L, n_heads, d_k).transpose(0, 2, 1, 3)
    V = (xv @ wv).reshape(B, L, n_heads, d_v).transpose(0, 2, 1, 3)
    scores = jnp.einsum('bhqd,bhkd->bhqk', Q, K) / jnp.sqrt(jnp.float32(d_k))
    scores = jnp.where(mask[:, None, :, :] > 0.5, -1e9, scores)
    attn = jax.nn.softmax(scores, axis=-1)
    ctx = jnp.einsum('bhqk,bhkd->bhqd', attn, V)
    ctx = ctx.transpose(0, 2, 1, 3).reshape(B, L, n_heads * d_v)
    out = ctx @ wo + xq
    mean = out.mean(-1, keepdims=True)
    var = ((out - mean) ** 2).mean(-1, keepdims=True)
    out = (out - mean) * jax.lax.rsqrt(var + eps) * gamma[0] + beta[0]
    return out, attn


if __name__ == "__main__":
    B, L, d_model = 2, 8, 32
    n_heads, d_k, d_v = 4, 8, 8

    key = jax.random.PRNGKey(0)
    k1, k2, k3, k4, k5, k6, k7, k8 = jax.random.split(key, 8)

    input_Q = jax.random.normal(k1, (B, L, d_model), dtype=jnp.float32)
    input_K = jax.random.normal(k2, (B, L, d_model), dtype=jnp.float32)
    input_V = jax.random.normal(k3, (B, L, d_model), dtype=jnp.float32)
    # attn_mask: 1.0 = masked position (bool semantics of masked_fill_)
    attn_mask = (jax.random.uniform(k4, (B, L, L)) < 0.25).astype(jnp.float32)

    s = 0.1
    W_Q = s * jax.random.normal(k5, (d_model, n_heads * d_k), dtype=jnp.float32)
    W_K = s * jax.random.normal(k6, (d_model, n_heads * d_k), dtype=jnp.float32)
    W_V = s * jax.random.normal(k7, (d_model, n_heads * d_v), dtype=jnp.float32)
    W_O = s * jax.random.normal(k8, (n_heads * d_v, d_model), dtype=jnp.float32)
    gamma = jnp.ones((1, d_model), dtype=jnp.float32)
    beta = jnp.zeros((1, d_model), dtype=jnp.float32)

    args = (input_Q, input_K, input_V, attn_mask,
            W_Q, W_K, W_V, W_O, gamma, beta)
    kw = dict(n_heads=n_heads, d_k=d_k, d_v=d_v)

    # f32 kernel (default) vs pure-JAX reference.
    out, attn = multi_head_attention(*args, **kw)
    out, attn = jax.block_until_ready((out, attn))
    out_want, attn_want = reference_mha(*args, **kw)

    assert out.shape == (B, L, d_model) and attn.shape == (B, n_heads, L, L)
    # tolerance covers the approx (EUP) reciprocal used for softmax norm
    assert jnp.allclose(out, out_want, atol=2e-3, rtol=2e-3)
    assert jnp.allclose(attn, attn_want, atol=2e-3, rtol=2e-3)

    # bf16-fed MXU variant (v6e/v7x recommendation); f32 accumulation and f32
    # softmax/LayerNorm, tolerances loosened only for bf16 input rounding.
    out_bf, attn_bf = multi_head_attention(*args, compute_dtype=jnp.bfloat16,
                                           **kw)
    out_bf, attn_bf = jax.block_until_ready((out_bf, attn_bf))
    assert jnp.allclose(out_bf, out_want, atol=5e-2, rtol=5e-2)
    assert jnp.allclose(attn_bf, attn_want, atol=3e-2, rtol=3e-2)

    print("KERNEL_OK")
</pallas_src>

<mosaic_0001>
module attributes {stable_mosaic.version = 11 : i64} {
  func.func @mha_kernel(%arg0: i32, %arg1: memref<2x8x32xf32, #tpu.memory_space<vmem>>, %arg2: memref<2x8x32xf32, #tpu.memory_space<vmem>>, %arg3: memref<2x8x32xf32, #tpu.memory_space<vmem>>, %arg4: memref<2x8x8xf32, #tpu.memory_space<vmem>>, %arg5: memref<4x32x8xf32, #tpu.memory_space<vmem>>, %arg6: memref<4x32x8xf32, #tpu.memory_space<vmem>>, %arg7: memref<4x32x8xf32, #tpu.memory_space<vmem>>, %arg8: memref<4x8x32xf32, #tpu.memory_space<vmem>>, %arg9: memref<2x32xf32, #tpu.memory_space<vmem>>, %arg10: memref<2x8x32xf32, #tpu.memory_space<vmem>>, %arg11: memref<8x8x8xf32, #tpu.memory_space<vmem>>) attributes {dimension_semantics = [#tpu.dimension_semantics<arbitrary>], iteration_bounds = array<i64: 1>, scalar_prefetch = 0 : i64, scratch_operands = 0 : i64, tpu.core_type = #tpu.core_type<tc>, window_params = [{pipeline_mode = #tpu.pipeline_mode<synchronous>, transform_indices = @transform_0, window_bounds = array<i64: 2, 8, 32>}, {pipeline_mode = #tpu.pipeline_mode<synchronous>, transform_indices = @transform_1, window_bounds = array<i64: 2, 8, 32>}, {pipeline_mode = #tpu.pipeline_mode<synchronous>, transform_indices = @transform_2, window_bounds = array<i64: 2, 8, 32>}, {pipeline_mode = #tpu.pipeline_mode<synchronous>, transform_indices = @transform_3, window_bounds = array<i64: 2, 8, 8>}, {pipeline_mode = #tpu.pipeline_mode<synchronous>, transform_indices = @transform_4, window_bounds = array<i64: 4, 32, 8>}, {pipeline_mode = #tpu.pipeline_mode<synchronous>, transform_indices = @transform_5, window_bounds = array<i64: 4, 32, 8>}, {pipeline_mode = #tpu.pipeline_mode<synchronous>, transform_indices = @transform_6, window_bounds = array<i64: 4, 32, 8>}, {pipeline_mode = #tpu.pipeline_mode<synchronous>, transform_indices = @transform_7, window_bounds = array<i64: 4, 8, 32>}, {pipeline_mode = #tpu.pipeline_mode<synchronous>, transform_indices = @transform_8, window_bounds = array<i64: 2, 32>}, {pipeline_mode = #tpu.pipeline_mode<synchronous>, transform_indices = @transform_9, window_bounds = array<i64: 2, 8, 32>}, {pipeline_mode = #tpu.pipeline_mode<synchronous>, transform_indices = @transform_10, window_bounds = array<i64: 8, 8, 8>}]} {
    %c0 = arith.constant 0 : index
    %c0_0 = arith.constant 0 : index
    %c0_1 = arith.constant 0 : index
    %0 = vector.load %arg1[%c0, %c0_0, %c0_1] : memref<2x8x32xf32, #tpu.memory_space<vmem>>, vector<2x8x32xf32>
    %c0_2 = arith.constant 0 : index
    %c0_3 = arith.constant 0 : index
    %c0_4 = arith.constant 0 : index
    %1 = vector.load %arg2[%c0_2, %c0_3, %c0_4] : memref<2x8x32xf32, #tpu.memory_space<vmem>>, vector<2x8x32xf32>
    %c0_5 = arith.constant 0 : index
    %c0_6 = arith.constant 0 : index
    %c0_7 = arith.constant 0 : index
    %2 = vector.load %arg3[%c0_5, %c0_6, %c0_7] : memref<2x8x32xf32, #tpu.memory_space<vmem>>, vector<2x8x32xf32>
    %3 = vector.shape_cast %0 : vector<2x8x32xf32> to vector<1x2x8x32xf32>
    %4 = vector.shape_cast %3 : vector<1x2x8x32xf32> to vector<1x2x8x32xf32>
    %5 = vector.broadcast %4 : vector<1x2x8x32xf32> to vector<4x2x8x32xf32>
    %6 = vector.shape_cast %5 : vector<4x2x8x32xf32> to vector<8x8x32xf32>
    %c0_8 = arith.constant 0 : index
    %c0_9 = arith.constant 0 : index
    %c0_10 = arith.constant 0 : index
    %7 = vector.load %arg5[%c0_8, %c0_9, %c0_10] : memref<4x32x8xf32, #tpu.memory_space<vmem>>, vector<4x32x8xf32>
    %8 = vector.shape_cast %7 : vector<4x32x8xf32> to vector<4x1x32x8xf32>
    %9 = vector.shape_cast %8 : vector<4x1x32x8xf32> to vector<4x1x32x8xf32>
    %10 = vector.broadcast %9 : vector<4x1x32x8xf32> to vector<4x2x32x8xf32>
    %11 = vector.shape_cast %10 : vector<4x2x32x8xf32> to vector<8x32x8xf32>
    "tpu.trace_start"() <{level = 10 : i32, message = "gld,gdk->glk"}> : () -> ()
    %cst = arith.constant dense<0.000000e+00> : vector<8x8x8xf32>
    %12 = tpu.matmul %6, %11, %cst {dimension_numbers = #tpu.dot_dimension_numbers<[2], [1], [1], [2], [0, 0, 0, 1, 1, 2], [0], [0]>} : vector<8x8x32xf32>, vector<8x32x8xf32>, vector<8x8x8xf32> -> vector<8x8x8xf32>
    "tpu.trace_stop"() : () -> ()
    %13 = vector.shape_cast %1 : vector<2x8x32xf32> to vector<1x2x8x32xf32>
    %14 = vector.shape_cast %13 : vector<1x2x8x32xf32> to vector<1x2x8x32xf32>
    %15 = vector.broadcast %14 : vector<1x2x8x32xf32> to vector<4x2x8x32xf32>
    %16 = vector.shape_cast %15 : vector<4x2x8x32xf32> to vector<8x8x32xf32>
    %c0_11 = arith.constant 0 : index
    %c0_12 = arith.constant 0 : index
    %c0_13 = arith.constant 0 : index
    %17 = vector.load %arg6[%c0_11, %c0_12, %c0_13] : memref<4x32x8xf32, #tpu.memory_space<vmem>>, vector<4x32x8xf32>
    %18 = vector.shape_cast %17 : vector<4x32x8xf32> to vector<4x1x32x8xf32>
    %19 = vector.shape_cast %18 : vector<4x1x32x8xf32> to vector<4x1x32x8xf32>
    %20 = vector.broadcast %19 : vector<4x1x32x8xf32> to vector<4x2x32x8xf32>
    %21 = vector.shape_cast %20 : vector<4x2x32x8xf32> to vector<8x32x8xf32>
    "tpu.trace_start"() <{level = 10 : i32, message = "gld,gdk->glk"}> : () -> ()
    %cst_14 = arith.constant dense<0.000000e+00> : vector<8x8x8xf32>
    %22 = tpu.matmul %16, %21, %cst_14 {dimension_numbers = #tpu.dot_dimension_numbers<[2], [1], [1], [2], [0, 0, 0, 1, 1, 2], [0], [0]>} : vector<8x8x32xf32>, vector<8x32x8xf32>, vector<8x8x8xf32> -> vector<8x8x8xf32>
    "tpu.trace_stop"() : () -> ()
    %23 = vector.shape_cast %2 : vector<2x8x32xf32> to vector<1x2x8x32xf32>
    %24 = vector.shape_cast %23 : vector<1x2x8x32xf32> to vector<1x2x8x32xf32>
    %25 = vector.broadcast %24 : vector<1x2x8x32xf32> to vector<4x2x8x32xf32>
    %26 = vector.shape_cast %25 : vector<4x2x8x32xf32> to vector<8x8x32xf32>
    %c0_15 = arith.constant 0 : index
    %c0_16 = arith.constant 0 : index
    %c0_17 = arith.constant 0 : index
    %27 = vector.load %arg7[%c0_15, %c0_16, %c0_17] : memref<4x32x8xf32, #tpu.memory_space<vmem>>, vector<4x32x8xf32>
    %28 = vector.shape_cast %27 : vector<4x32x8xf32> to vector<4x1x32x8xf32>
    %29 = vector.shape_cast %28 : vector<4x1x32x8xf32> to vector<4x1x32x8xf32>
    %30 = vector.broadcast %29 : vector<4x1x32x8xf32> to vector<4x2x32x8xf32>
    %31 = vector.shape_cast %30 : vector<4x2x32x8xf32> to vector<8x32x8xf32>
    "tpu.trace_start"() <{level = 10 : i32, message = "gld,gdk->glk"}> : () -> ()
    %cst_18 = arith.constant dense<0.000000e+00> : vector<8x8x8xf32>
    %32 = tpu.matmul %26, %31, %cst_18 {dimension_numbers = #tpu.dot_dimension_numbers<[2], [1], [1], [2], [0, 0, 0, 1, 1, 2], [0], [0]>} : vector<8x8x32xf32>, vector<8x32x8xf32>, vector<8x8x8xf32> -> vector<8x8x8xf32>
    "tpu.trace_stop"() : () -> ()
    %cst_19 = arith.constant 0.353553385 : f32
    %33 = vector.broadcast %cst_19 : f32 to vector<8x8x8xf32>
    %34 = arith.mulf %12, %33 : vector<8x8x8xf32>
    %c0_20 = arith.constant 0 : index
    %c0_21 = arith.constant 0 : index
    %c0_22 = arith.constant 0 : index
    %35 = vector.load %arg4[%c0_20, %c0_21, %c0_22] : memref<2x8x8xf32, #tpu.memory_space<vmem>>, vector<2x8x8xf32>
    %cst_23 = arith.constant 5.000000e-01 : f32
    %36 = vector.broadcast %cst_23 : f32 to vector<2x8x8xf32>
    %37 = arith.cmpf ogt, %35, %36 : vector<2x8x8xf32>
    %cst_24 = arith.constant -1.000000e+09 : f32
    %cst_25 = arith.constant 0.000000e+00 : f32
    %38 = vector.broadcast %cst_24 : f32 to vector<2x8x8xf32>
    %39 = vector.broadcast %cst_25 : f32 to vector<2x8x8xf32>
    %40 = arith.select %37, %38, %39 : vector<2x8x8xi1>, vector<2x8x8xf32>
    %41 = vector.shape_cast %40 : vector<2x8x8xf32> to vector<1x2x8x8xf32>
    %42 = vector.shape_cast %41 : vector<1x2x8x8xf32> to vector<1x2x8x8xf32>
    %43 = vector.broadcast %42 : vector<1x2x8x8xf32> to vector<4x2x8x8xf32>
    %44 = vector.shape_cast %43 : vector<4x2x8x8xf32> to vector<8x8x8xf32>
    "tpu.trace_start"() <{level = 10 : i32, message = "gqd,gkd->gqk"}> : () -> ()
    %cst_26 = arith.constant dense<0.000000e+00> : vector<8x8x8xf32>
    %45 = tpu.matmul %34, %22, %cst_26 {dimension_numbers = #tpu.dot_dimension_numbers<[2], [2], [1], [1], [0, 0, 0, 1, 1, 1], [0], [0]>} : vector<8x8x8xf32>, vector<8x8x8xf32>, vector<8x8x8xf32> -> vector<8x8x8xf32>
    "tpu.trace_stop"() : () -> ()
    %46 = arith.addf %45, %44 : vector<8x8x8xf32>
    %cst_27 = arith.constant dense<0xFF800000> : vector<8x8xf32>
    %47 = vector.multi_reduction <maximumf>, %46, %cst_27 [2] : vector<8x8x8xf32> to vector<8x8xf32>
    %48 = vector.shape_cast %47 : vector<8x8xf32> to vector<8x8x1xf32>
    %49 = vector.broadcast %48 : vector<8x8x1xf32> to vector<8x8x8xf32>
    %50 = arith.subf %46, %49 : vector<8x8x8xf32>
    %51 = math.exp %50 : vector<8x8x8xf32>
    %cst_28 = arith.constant dense<0.000000e+00> : vector<8x8xf32>
    %52 = vector.multi_reduction <add>, %51, %cst_28 [2] : vector<8x8x8xf32> to vector<8x8xf32>
    %53 = vector.shape_cast %52 : vector<8x8xf32> to vector<8x8x1xf32>
    %54 = tpu.reciprocal %53 {approx = true} : vector<8x8x1xf32> -> vector<8x8x1xf32>
    %55 = vector.broadcast %54 : vector<8x8x1xf32> to vector<8x8x8xf32>
    %56 = arith.mulf %51, %55 : vector<8x8x8xf32>
    %c0_29 = arith.constant 0 : index
    %c0_30 = arith.constant 0 : index
    %c0_31 = arith.constant 0 : index
    %57 = vector.load %arg11[%c0_29, %c0_30, %c0_31] : memref<8x8x8xf32, #tpu.memory_space<vmem>>, vector<8x8x8xf32>
    tpu.vector_store %arg11[%c0_29, %c0_30, %c0_31], %56 {strides = array<i32>} : memref<8x8x8xf32, #tpu.memory_space<vmem>>, vector<8x8x8xf32>,
    "tpu.trace_start"() <{level = 10 : i32, message = "gqk,gkd->gqd"}> : () -> ()
    %cst_32 = arith.constant dense<0.000000e+00> : vector<8x8x8xf32>
    %58 = tpu.matmul %56, %32, %cst_32 {dimension_numbers = #tpu.dot_dimension_numbers<[2], [1], [1], [2], [0, 0, 0, 1, 1, 2], [0], [0]>} : vector<8x8x8xf32>, vector<8x8x8xf32>, vector<8x8x8xf32> -> vector<8x8x8xf32>
    "tpu.trace_stop"() : () -> ()
    %c0_33 = arith.constant 0 : index
    %c0_34 = arith.constant 0 : index
    %c0_35 = arith.constant 0 : index
    %59 = vector.load %arg8[%c0_33, %c0_34, %c0_35] : memref<4x8x32xf32, #tpu.memory_space<vmem>>, vector<4x8x32xf32>
    %60 = vector.shape_cast %59 : vector<4x8x32xf32> to vector<4x1x8x32xf32>
    %61 = vector.shape_cast %60 : vector<4x1x8x32xf32> to vector<4x1x8x32xf32>
    %62 = vector.broadcast %61 : vector<4x1x8x32xf32> to vector<4x2x8x32xf32>
    %63 = vector.shape_cast %62 : vector<4x2x8x32xf32> to vector<8x8x32xf32>
    "tpu.trace_start"() <{level = 10 : i32, message = "glj,gjd->gld"}> : () -> ()
    %cst_36 = arith.constant dense<0.000000e+00> : vector<8x8x32xf32>
    %64 = tpu.matmul %58, %63, %cst_36 {dimension_numbers = #tpu.dot_dimension_numbers<[2], [1], [1], [2], [0, 0, 0, 1, 1, 2], [0], [0]>} : vector<8x8x8xf32>, vector<8x8x32xf32>, vector<8x8x32xf32> -> vector<8x8x32xf32>
    "tpu.trace_stop"() : () -> ()
    %65 = vector.shape_cast %64 : vector<8x8x32xf32> to vector<4x2x8x32xf32>
    %cst_37 = arith.constant dense<0.000000e+00> : vector<2x8x32xf32>
    %66 = vector.multi_reduction <add>, %65, %cst_37 [0] : vector<4x2x8x32xf32> to vector<2x8x32xf32>
    %67 = arith.addf %66, %0 : vector<2x8x32xf32>
    %cst_38 = arith.constant dense<0.000000e+00> : vector<2x8xf32>
    %68 = vector.multi_reduction <add>, %67, %cst_38 [2] : vector<2x8x32xf32> to vector<2x8xf32>
    %69 = vector.shape_cast %68 : vector<2x8xf32> to vector<2x8x1xf32>
    %cst_39 = arith.constant 3.200000e+01 : f32
    %70 = vector.broadcast %cst_39 : f32 to vector<2x8x1xf32>
    %71 = arith.divf %69, %70 : vector<2x8x1xf32>
    %72 = vector.broadcast %71 : vector<2x8x1xf32> to vector<2x8x32xf32>
    %73 = arith.subf %67, %72 : vector<2x8x32xf32>
    %74 = arith.mulf %73, %73 : vector<2x8x32xf32>
    %cst_40 = arith.constant dense<0.000000e+00> : vector<2x8xf32>
    %75 = vector.multi_reduction <add>, %74, %cst_40 [2] : vector<2x8x32xf32> to vector<2x8xf32>
    %76 = vector.shape_cast %75 : vector<2x8xf32> to vector<2x8x1xf32>
    %cst_41 = arith.constant 3.200000e+01 : f32
    %77 = vector.broadcast %cst_41 : f32 to vector<2x8x1xf32>
    %78 = arith.divf %76, %77 : vector<2x8x1xf32>
    %79 = vector.broadcast %71 : vector<2x8x1xf32> to vector<2x8x32xf32>
    %80 = arith.subf %67, %79 : vector<2x8x32xf32>
    %cst_42 = arith.constant 9.99999974E-6 : f32
    %81 = vector.broadcast %cst_42 : f32 to vector<2x8x1xf32>
    %82 = arith.addf %78, %81 : vector<2x8x1xf32>
    %83 = math.rsqrt %82 : vector<2x8x1xf32>
    %84 = vector.broadcast %83 : vector<2x8x1xf32> to vector<2x8x32xf32>
    %85 = arith.mulf %80, %84 : vector<2x8x32xf32>
    %c0_43 = arith.constant 0 : index
    %c0_44 = arith.constant 0 : index
    %86 = vector.load %arg9[%c0_43, %c0_44] : memref<2x32xf32, #tpu.memory_space<vmem>>, vector<1x32xf32>
    %c1 = arith.constant 1 : index
    %c0_45 = arith.constant 0 : index
    %87 = vector.load %arg9[%c1, %c0_45] : memref<2x32xf32, #tpu.memory_space<vmem>>, vector<1x32xf32>
    %88 = vector.shape_cast %86 : vector<1x32xf32> to vector<1x1x32xf32>
    %89 = vector.broadcast %88 : vector<1x1x32xf32> to vector<2x8x32xf32>
    %90 = arith.mulf %85, %89 : vector<2x8x32xf32>
    %91 = vector.shape_cast %87 : vector<1x32xf32> to vector<1x1x32xf32>
    %92 = vector.broadcast %91 : vector<1x1x32xf32> to vector<2x8x32xf32>
    %93 = arith.addf %90, %92 : vector<2x8x32xf32>
    %c0_46 = arith.constant 0 : index
    %c0_47 = arith.constant 0 : index
    %c0_48 = arith.constant 0 : index
    %94 = vector.load %arg10[%c0_46, %c0_47, %c0_48] : memref<2x8x32xf32, #tpu.memory_space<vmem>>, vector<2x8x32xf32>
    tpu.vector_store %arg10[%c0_46, %c0_47, %c0_48], %93 {strides = array<i32>} : memref<2x8x32xf32, #tpu.memory_space<vmem>>, vector<2x8x32xf32>,
    return
  }
  func.func @transform_0(%arg0: i32) -> (i32, i32, i32) {
    %c0_i32 = arith.constant 0 : i32
    %c0_i32_0 = arith.constant 0 : i32
    %c0_i32_1 = arith.constant 0 : i32
    %c0_i32_2 = arith.constant 0 : i32
    return %c0_i32, %c0_i32_0, %c0_i32_1 : i32, i32, i32
  }
  func.func @transform_1(%arg0: i32) -> (i32, i32, i32) {
    %c0_i32 = arith.constant 0 : i32
    %c0_i32_0 = arith.constant 0 : i32
    %c0_i32_1 = arith.constant 0 : i32
    %c0_i32_2 = arith.constant 0 : i32
    return %c0_i32, %c0_i32_0, %c0_i32_1 : i32, i32, i32
  }
  func.func @transform_2(%arg0: i32) -> (i32, i32, i32) {
    %c0_i32 = arith.constant 0 : i32
    %c0_i32_0 = arith.constant 0 : i32
    %c0_i32_1 = arith.constant 0 : i32
    %c0_i32_2 = arith.constant 0 : i32
    return %c0_i32, %c0_i32_0, %c0_i32_1 : i32, i32, i32
  }
  func.func @transform_3(%arg0: i32) -> (i32, i32, i32) {
    %c0_i32 = arith.constant 0 : i32
    %c0_i32_0 = arith.constant 0 : i32
    %c0_i32_1 = arith.constant 0 : i32
    %c0_i32_2 = arith.constant 0 : i32
    return %c0_i32, %c0_i32_0, %c0_i32_1 : i32, i32, i32
  }
  func.func @transform_4(%arg0: i32) -> (i32, i32, i32) {
    %c0_i32 = arith.constant 0 : i32
    %c0_i32_0 = arith.constant 0 : i32
    %c0_i32_1 = arith.constant 0 : i32
    %c0_i32_2 = arith.constant 0 : i32
    return %c0_i32, %c0_i32_0, %c0_i32_1 : i32, i32, i32
  }
  func.func @transform_5(%arg0: i32) -> (i32, i32, i32) {
    %c0_i32 = arith.constant 0 : i32
    %c0_i32_0 = arith.constant 0 : i32
    %c0_i32_1 = arith.constant 0 : i32
    %c0_i32_2 = arith.constant 0 : i32
    return %c0_i32, %c0_i32_0, %c0_i32_1 : i32, i32, i32
  }
  func.func @transform_6(%arg0: i32) -> (i32, i32, i32) {
    %c0_i32 = arith.constant 0 : i32
    %c0_i32_0 = arith.constant 0 : i32
    %c0_i32_1 = arith.constant 0 : i32
    %c0_i32_2 = arith.constant 0 : i32
    return %c0_i32, %c0_i32_0, %c0_i32_1 : i32, i32, i32
  }
  func.func @transform_7(%arg0: i32) -> (i32, i32, i32) {
    %c0_i32 = arith.constant 0 : i32
    %c0_i32_0 = arith.constant 0 : i32
    %c0_i32_1 = arith.constant 0 : i32
    %c0_i32_2 = arith.constant 0 : i32
    return %c0_i32, %c0_i32_0, %c0_i32_1 : i32, i32, i32
  }
  func.func @transform_8(%arg0: i32) -> (i32, i32) {
    %c0_i32 = arith.constant 0 : i32
    %c0_i32_0 = arith.constant 0 : i32
    %c0_i32_1 = arith.constant 0 : i32
    return %c0_i32, %c0_i32_0 : i32, i32
  }
  func.func @transform_9(%arg0: i32) -> (i32, i32, i32) {
    %c0_i32 = arith.constant 0 : i32
    %c0_i32_0 = arith.constant 0 : i32
    %c0_i32_1 = arith.constant 0 : i32
    %c0_i32_2 = arith.constant 0 : i32
    return %c0_i32, %c0_i32_0, %c0_i32_1 : i32, i32, i32
  }
  func.func @transform_10(%arg0: i32) -> (i32, i32, i32) {
    %c0_i32 = arith.constant 0 : i32
    %c0_i32_0 = arith.constant 0 : i32
    %c0_i32_1 = arith.constant 0 : i32
    %c0_i32_2 = arith.constant 0 : i32
    return %c0_i32, %c0_i32_0, %c0_i32_1 : i32, i32, i32
  }
}

</mosaic_0001>

<bundles_post_ra>
// kernel: tpu_custom_call.1
= control target key start
LH: loop header
LB: loop body
LE: loop exit
PB: predicated region body
PF: predicated region fallthrough
CT: control target
= control target key end

     0   :  { %16 = vsyncpa [#allocation3], 0  ;;  %v4618_v3 = vmov 0.0|0.0   ;;  %vm4619_vm0 = vmmov 0   ;;  %v4620_v6 = vmov 0.0   ;;  %vm58_vm1 = vcmask 261120   ;;  %s5198_s0 = inlined_call_operand.vmem [shape: f32[2,8,32], index: 0, kind: input, shape index: {}]   ;;  %s5199_s1 = inlined_call_operand.vmem [shape: f32[2,8,32], index: 1, kind: input, shape index: {}]   ;;  %s5200_s2 = inlined_call_operand.vmem [shape: f32[2,8,32], index: 2, kind: input, shape index: {}]   ;;  %s5201_s3 = inlined_call_operand.vmem [shape: f32[2,8,8], index: 3, kind: input, shape index: {}]   ;;  %s5202_s4 = inlined_call_operand.vmem [shape: f32[4,32,8], index: 4, kind: input, shape index: {}]   ;;  %s5203_s5 = inlined_call_operand.vmem [shape: f32[4,32,8], index: 5, kind: input, shape index: {}]   ;;  %s5204_s6 = inlined_call_operand.vmem [shape: f32[4,32,8], index: 6, kind: input, shape index: {}]   ;;  %s5205_s7 = inlined_call_operand.vmem [shape: f32[4,8,32], index: 7, kind: input, shape index: {}]   ;;  %s5206_s8 = inlined_call_operand.vmem [shape: f32[2,32], index: 8, kind: input, shape index: {}]   ;;  %s5207_s9 = inlined_call_operand.hbm [shape: f32[2,8,32], index: 9, kind: output, shape index: {0}]   ;;  %s5208_s10 = inlined_call_operand.hbm [shape: f32[8,8,8], index: 10, kind: output, shape index: {1}]  }
   0x1   :  { %v42_v0 = vld [vmem:[%s5202_s4] sm:$0xff]  ;;  %v43_v1 = vld [vmem:[%s5202_s4 + $0x8] sm:$0xff]  ;;  %v44_v2 = vld [vmem:[%s5202_s4 + $0x10] sm:$0xff]  ;;  %4381 = vmatprep.subr.bf16.mxu0 %v4618_v3  ;;  %4387 = vmatprep.subr.bf16.mxu1 %v4618_v3 }
   0x2   :  { %v4382_v4 = vpack.c.bf16 %v43_v1, %v42_v0  ;;  %v45_v5 = vld [vmem:[%s5202_s4 + $0x18] sm:$0xff]  ;;  %4005 = vmatprep.mubr.msk.f32.mxu0 %vm4619_vm0, %v4620_v6  ;;  %4016 = vmatprep.mubr.msk.f32.mxu1 %vm4619_vm0, %v4620_v6  ;;  %v46_v8 = vld [vmem:[%s5202_s4 + $0x20] sm:$0xff]  ;;  %v47_v9 = vld [vmem:[%s5202_s4 + $0x28] sm:$0xff] }
   0x3   :  { %v4385_v7 = vpack.c.bf16 %v45_v5, %v44_v2  ;;  %v4709_v10 = vld [vmem:[%s5198_s0] sm:$0xff]  ;;  %v37_v11 = vld [vmem:[%s5198_s0 + $0x8] sm:$0xff]  ;;  %v4394_v12 = vpack.c.bf16 %v47_v9, %v46_v8  ;;  %v48_v13 = vld [vmem:[%s5202_s4 + $0x30] sm:$0xff] }
   0x4   :  { %4383 = vmatpush3.bf16.msra.mxu0 %v4382_v4  ;;  %4389 = vmatpush3.bf16.msra.mxu1 %v4382_v4  ;;  %v49_v14 = vld [vmem:[%s5202_s4 + $0x38] sm:$0xff]  ;;  %v50_v16 = vld [vmem:[%s5202_s4 + $0x40] sm:$0xff]  ;;  %v51_v17 = vld [vmem:[%s5202_s4 + $0x48] sm:$0xff] }
   0x5   :  { %4384 = vmatprep.subr.bf16.mxu0 %v4618_v3  ;;  %4390 = vmatprep.subr.bf16.mxu1 %v4618_v3  ;;  %v4397_v15 = vpack.c.bf16 %v49_v14, %v48_v13 }
   0x8   :  { %4386 = vmatpush3.bf16.msra.mxu0 %v4385_v7  ;;  %4392 = vmatpush3.bf16.msra.mxu1 %v4385_v7 }
   0x9   :  { %4393 = vmatprep.subr.bf16.mxu0 %v4618_v3  ;;  %4399 = vmatprep.subr.bf16.mxu1 %v4618_v3 }
   0xb   :  { %4006 = vmatmul.mubr.msk.f32.vlgmr.msra.gmra.mrb[0].mxu0 %vm58_vm1, %v4709_v10  ;;  %4017 = vmatmul.mubr.msk.f32.vlgmr.msra.gmra.mrb[0].mxu1 %vm58_vm1, %v37_v11 }
   0xc   :  { %4395 = vmatpush3.bf16.msra.mxu0 %v4394_v12  ;;  %4401 = vmatpush3.bf16.msra.mxu1 %v4394_v12 }
   0xd   :  { %4396 = vmatprep.subr.bf16.mxu0 %v4618_v3  ;;  %4402 = vmatprep.subr.bf16.mxu1 %v4618_v3 }
   0xe   :  { %17 = vsyncpa [#allocation5], 0  ;;  %4027 = vmatprep.mubr.msk.f32.mxu0 %vm4619_vm0, %v4620_v6  ;;  %4038 = vmatprep.mubr.msk.f32.mxu1 %vm4619_vm0, %v4620_v6  ;;  %v4406_v18 = vpack.c.bf16 %v51_v17, %v50_v16  ;;  %v52_v19 = vld [vmem:[%s5202_s4 + $0x50] sm:$0xff]  ;;  %v53_v20 = vld [vmem:[%s5202_s4 + $0x58] sm:$0xff]  ;;  %vm1803_vm2 = vcmask 64512  }
   0xf   :  { %v4409_v21 = vpack.c.bf16 %v53_v20, %v52_v19  ;;  %v54_v22 = vld [vmem:[%s5202_s4 + $0x60] sm:$0xff]  ;;  %v55_v23 = vld [vmem:[%s5202_s4 + $0x68] sm:$0xff]  ;;  %v56_v25 = vld [vmem:[%s5202_s4 + $0x70] sm:$0xff] }
  0x10   :  { %4398 = vmatpush3.bf16.msra.mxu0 %v4397_v15  ;;  %4404 = vmatpush3.bf16.msra.mxu1 %v4397_v15  ;;  %v4418_v24 = vpack.c.bf16 %v55_v23, %v54_v22  ;;  %v57_v26 = vld [vmem:[%s5202_s4 + $0x78] sm:$0xff]  ;;  %v625_v28 = vld [vmem:[%s5203_s5] sm:$0xff]  ;;  %v626_v29 = vld [vmem:[%s5203_s5 + $0x8] sm:$0xff] }
  0x11   :  { %4405 = vmatprep.subr.bf16.mxu0 %v4618_v3  ;;  %4411 = vmatprep.subr.bf16.mxu1 %v4618_v3  ;;  %v4421_v27 = vpack.c.bf16 %v57_v26, %v56_v25  ;;  %v4430_v30 = vpack.c.bf16 %v626_v29, %v625_v28  ;;  %v627_v31 = vld [vmem:[%s5203_s5 + $0x10] sm:$0xff]  ;;  %v628_v32 = vld [vmem:[%s5203_s5 + $0x18] sm:$0xff]  ;;  %v629_v34 = vld [vmem:[%s5203_s5 + $0x20] sm:$0xff] }
  0x12   :  { %v4433_v33 = vpack.c.bf16 %v628_v32, %v627_v31  ;;  %v630_v35 = vld [vmem:[%s5203_s5 + $0x28] sm:$0xff]  ;;  %v38_v36 = vld [vmem:[%s5199_s1] sm:$0xff]  ;;  %v631_v39 = vld [vmem:[%s5203_s5 + $0x30] sm:$0xff] }
  0x13   :  { %4028 = vmatmul.mubr.msk.f32.vlgmr.msra.gmra.mrb[2].mxu0 %vm58_vm1, %v4709_v10  ;;  %4039 = vmatmul.mubr.msk.f32.vlgmr.msra.gmra.mrb[2].mxu1 %vm58_vm1, %v37_v11  ;;  %v39_v37 = vld [vmem:[%s5199_s1 + $0x8] sm:$0xff]  ;;  %v4442_v38 = vpack.c.bf16 %v630_v35, %v629_v34  ;;  %v632_v40 = vld [vmem:[%s5203_s5 + $0x38] sm:$0xff]  ;;  %v633_v42 = vld [vmem:[%s5203_s5 + $0x40] sm:$0xff] }
  0x14   :  { %4407 = vmatpush3.bf16.msra.mxu0 %v4406_v18  ;;  %4413 = vmatpush3.bf16.msra.mxu1 %v4406_v18  ;;  %v4445_v41 = vpack.c.bf16 %v632_v40, %v631_v39  ;;  %v634_v43 = vld [vmem:[%s5203_s5 + $0x48] sm:$0xff]  ;;  %v635_v45 = vld [vmem:[%s5203_s5 + $0x50] sm:$0xff]  ;;  %v636_v46 = vld [vmem:[%s5203_s5 + $0x58] sm:$0xff] }
  0x15   :  { %4408 = vmatprep.subr.bf16.mxu0 %v4618_v3  ;;  %4414 = vmatprep.subr.bf16.mxu1 %v4618_v3  ;;  %v4454_v44 = vpack.c.bf16 %v634_v43, %v633_v42  ;;  %v4457_v47 = vpack.c.bf16 %v636_v46, %v635_v45  ;;  %v637_v48 = vld [vmem:[%s5203_s5 + $0x60] sm:$0xff]  ;;  %v638_v49 = vld [vmem:[%s5203_s5 + $0x68] sm:$0xff]  ;;  %v639_v51 = vld [vmem:[%s5203_s5 + $0x70] sm:$0xff] }
  0x16   :  { %4049 = vmatprep.mubr.msk.f32.mxu0 %vm4619_vm0, %v4620_v6  ;;  %4060 = vmatprep.mubr.msk.f32.mxu1 %vm4619_vm0, %v4620_v6  ;;  %v4466_v50 = vpack.c.bf16 %v638_v49, %v637_v48  ;;  %v640_v52 = vld [vmem:[%s5203_s5 + $0x78] sm:$0xff]  ;;  %v1207_v54 = vld [vmem:[%s5204_s6] sm:$0xff]  ;;  %v1208_v55 = vld [vmem:[%s5204_s6 + $0x8] sm:$0xff] }
  0x17   :  { %v4469_v53 = vpack.c.bf16 %v640_v52, %v639_v51  ;;  %v4478_v56 = vpack.c.bf16 %v1208_v55, %v1207_v54  ;;  %v1209_v57 = vld [vmem:[%s5204_s6 + $0x10] sm:$0xff]  ;;  %v1210_v58 = vld [vmem:[%s5204_s6 + $0x18] sm:$0xff]  ;;  %v40_v60 = vld [vmem:[%s5200_s2] sm:$0xff] }
  0x18   :  { %4410 = vmatpush3.bf16.msra.mxu0 %v4409_v21  ;;  %4416 = vmatpush3.bf16.msra.mxu1 %v4409_v21  ;;  %v4481_v59 = vpack.c.bf16 %v1210_v58, %v1209_v57  ;;  %v41_v61 = vld [vmem:[%s5200_s2 + $0x8] sm:$0xff]  ;;  %v1211_v62 = vld [vmem:[%s5204_s6 + $0x20] sm:$0xff]  ;;  %v1213_v1 = vld [vmem:[%s5204_s6 + $0x30] sm:$0xff] }
  0x19   :  { %4417 = vmatprep.subr.bf16.mxu0 %v4618_v3  ;;  %4423 = vmatprep.subr.bf16.mxu1 %v4618_v3  ;;  %v1212_v63 = vld [vmem:[%s5204_s6 + $0x28] sm:$0xff]  ;;  %v1214_v2 = vld [vmem:[%s5204_s6 + $0x38] sm:$0xff]  ;;  %v1215_v5 = vld [vmem:[%s5204_s6 + $0x40] sm:$0xff] }
  0x1a   :  { %v4490_v0 = vpack.c.bf16 %v1212_v63, %v1211_v62  ;;  %v4493_v4 = vpack.c.bf16 %v1214_v2, %v1213_v1  ;;  %v1216_v7 = vld [vmem:[%s5204_s6 + $0x48] sm:$0xff]  ;;  %v1217_v9 = vld [vmem:[%s5204_s6 + $0x50] sm:$0xff]  ;;  %v1219_v12 = vld [vmem:[%s5204_s6 + $0x60] sm:$0xff] }
  0x1b   :  { %4050 = vmatmul.mubr.msk.f32.vlgmr.msra.gmra.mrb[4].mxu0 %vm58_vm1, %v4709_v10  ;;  %4061 = vmatmul.mubr.msk.f32.vlgmr.msra.gmra.mrb[4].mxu1 %vm58_vm1, %v37_v11  ;;  %v4502_v8 = vpack.c.bf16 %v1216_v7, %v1215_v5  ;;  %v1220_v13 = vld [vmem:[%s5204_s6 + $0x68] sm:$0xff]  ;;  %v1221_v15 = vld [vmem:[%s5204_s6 + $0x70] sm:$0xff]  ;;  %v1222_v16 = vld [vmem:[%s5204_s6 + $0x78] sm:$0xff] }
  0x1c   :  { %4419 = vmatpush3.bf16.msra.mxu0 %v4418_v24  ;;  %4425 = vmatpush3.bf16.msra.mxu1 %v4418_v24  ;;  %v4514_v14 = vpack.c.bf16 %v1220_v13, %v1219_v12  ;;  %v4517_v17 = vpack.c.bf16 %v1222_v16, %v1221_v15  ;;  %v1798_v12 = vld [vmem:[%s5201_s3 + $0x8] sm:$0xff] }
  0x1d   :  { %4420 = vmatprep.subr.bf16.mxu0 %v4618_v3  ;;  %4426 = vmatprep.subr.bf16.mxu1 %v4618_v3  ;;  %vm1800_vm4 = vcmp.gt.f32.partialorder %v1798_v12, 0.5 }
  0x1e   :  { %4071 = vmatprep.mubr.msk.f32.mxu0 %vm4619_vm0, %v4620_v6  ;;  %4082 = vmatprep.mubr.msk.f32.mxu1 %vm4619_vm0, %v4620_v6  ;;  %v1802_v15 = vsel %vm1800_vm4, -1e+09, %v4620_v6 }
  0x20   :  { %4422 = vmatpush3.bf16.msra.mxu0 %v4421_v27  ;;  %4428 = vmatpush3.bf16.msra.mxu1 %v4421_v27 }
  0x21   :  { %4429 = vmatprep.subr.bf16.mxu0 %v4618_v3  ;;  %4435 = vmatprep.subr.bf16.mxu1 %v4618_v3 }
  0x23   :  { %4072 = vmatmul.mubr.msk.f32.vlgmr.msra.gmra.mrb[6].mxu0 %vm58_vm1, %v4709_v10  ;;  %4083 = vmatmul.mubr.msk.f32.vlgmr.msra.gmra.mrb[6].mxu1 %vm58_vm1, %v37_v11  ;;  %v1218_v10 = vld [vmem:[%s5204_s6 + $0x58] sm:$0xff] }
  0x24   :  { %4431 = vmatpush3.bf16.msra.mxu0 %v4430_v30  ;;  %4437 = vmatpush3.bf16.msra.mxu1 %v4430_v30  ;;  %v4505_v11 = vpack.c.bf16 %v1218_v10, %v1217_v9 }
  0x25   :  { %4432 = vmatprep.subr.bf16.mxu0 %v4618_v3  ;;  %4438 = vmatprep.subr.bf16.mxu1 %v4618_v3 }
  0x26   :  { %4093 = vmatprep.mubr.msk.f32.mxu0 %vm4619_vm0, %v4620_v6  ;;  %4104 = vmatprep.mubr.msk.f32.mxu1 %vm4619_vm0, %v4620_v6 }
  0x28   :  { %4434 = vmatpush3.bf16.msra.mxu0 %v4433_v33  ;;  %4440 = vmatpush3.bf16.msra.mxu1 %v4433_v33 }
  0x29   :  { %4441 = vmatprep.subr.bf16.mxu0 %v4618_v3  ;;  %4447 = vmatprep.subr.bf16.mxu1 %v4618_v3 }
  0x2b   :  { %4094 = vmatmul.mubr.msk.f32.vlgmr.msra.gmra.mrb[8].mxu0 %vm58_vm1, %v38_v36  ;;  %4105 = vmatmul.mubr.msk.f32.vlgmr.msra.gmra.mrb[8].mxu1 %vm58_vm1, %v39_v37 }
  0x2c   :  { %4443 = vmatpush3.bf16.msra.mxu0 %v4442_v38  ;;  %4449 = vmatpush3.bf16.msra.mxu1 %v4442_v38 }
  0x2d   :  { %4444 = vmatprep.subr.bf16.mxu0 %v4618_v3  ;;  %4450 = vmatprep.subr.bf16.mxu1 %v4618_v3 }
  0x2e   :  { %4115 = vmatprep.mubr.msk.f32.mxu0 %vm4619_vm0, %v4620_v6  ;;  %4126 = vmatprep.mubr.msk.f32.mxu1 %vm4619_vm0, %v4620_v6 }
  0x30   :  { %4446 = vmatpush3.bf16.msra.mxu0 %v4445_v41  ;;  %4452 = vmatpush3.bf16.msra.mxu1 %v4445_v41 }
  0x31   :  { %4453 = vmatprep.subr.bf16.mxu0 %v4618_v3  ;;  %4459 = vmatprep.subr.bf16.mxu1 %v4618_v3 }
  0x33   :  { %4116 = vmatmul.mubr.msk.f32.vlgmr.msra.gmra.mrb[10].mxu0 %vm58_vm1, %v38_v36  ;;  %4127 = vmatmul.mubr.msk.f32.vlgmr.msra.gmra.mrb[10].mxu1 %vm58_vm1, %v39_v37 }
  0x34   :  { %4455 = vmatpush3.bf16.msra.mxu0 %v4454_v44  ;;  %4461 = vmatpush3.bf16.msra.mxu1 %v4454_v44 }
  0x35   :  { %4456 = vmatprep.subr.bf16.mxu0 %v4618_v3  ;;  %4462 = vmatprep.subr.bf16.mxu1 %v4618_v3 }
  0x36   :  { %4137 = vmatprep.mubr.msk.f32.mxu0 %vm4619_vm0, %v4620_v6  ;;  %4148 = vmatprep.mubr.msk.f32.mxu1 %vm4619_vm0, %v4620_v6 }
  0x38   :  { %4458 = vmatpush3.bf16.msra.mxu0 %v4457_v47  ;;  %4464 = vmatpush3.bf16.msra.mxu1 %v4457_v47 }
  0x39   :  { %4465 = vmatprep.subr.bf16.mxu0 %v4618_v3  ;;  %4471 = vmatprep.subr.bf16.mxu1 %v4618_v3 }
  0x3b   :  { %4138 = vmatmul.mubr.msk.f32.vlgmr.msra.gmra.mrb[12].mxu0 %vm58_vm1, %v38_v36  ;;  %4149 = vmatmul.mubr.msk.f32.vlgmr.msra.gmra.mrb[12].mxu1 %vm58_vm1, %v39_v37 }
  0x3c   :  { %4467 = vmatpush3.bf16.msra.mxu0 %v4466_v50  ;;  %4473 = vmatpush3.bf16.msra.mxu1 %v4466_v50 }
  0x3d   :  { %4468 = vmatprep.subr.bf16.mxu0 %v4618_v3  ;;  %4474 = vmatprep.subr.bf16.mxu1 %v4618_v3 }
  0x3e   :  { %4159 = vmatprep.mubr.msk.f32.mxu0 %vm4619_vm0, %v4620_v6  ;;  %4170 = vmatprep.mubr.msk.f32.mxu1 %vm4619_vm0, %v4620_v6 }
  0x40   :  { %4470 = vmatpush3.bf16.msra.mxu0 %v4469_v53  ;;  %4476 = vmatpush3.bf16.msra.mxu1 %v4469_v53 }
  0x41   :  { %4477 = vmatprep.subr.bf16.mxu0 %v4618_v3  ;;  %4483 = vmatprep.subr.bf16.mxu1 %v4618_v3 }
  0x43   :  { %4160 = vmatmul.mubr.msk.f32.vlgmr.msra.gmra.mrb[14].mxu0 %vm58_vm1, %v38_v36  ;;  %4171 = vmatmul.mubr.msk.f32.vlgmr.msra.gmra.mrb[14].mxu1 %vm58_vm1, %v39_v37 }
  0x44   :  { %4479 = vmatpush3.bf16.msra.mxu0 %v4478_v56  ;;  %4485 = vmatpush3.bf16.msra.mxu1 %v4478_v56 }
  0x45   :  { %4480 = vmatprep.subr.bf16.mxu0 %v4618_v3  ;;  %4486 = vmatprep.subr.bf16.mxu1 %v4618_v3 }
  0x46   :  { %4181 = vmatprep.mubr.msk.f32.mxu0 %vm4619_vm0, %v4620_v6  ;;  %4192 = vmatprep.mubr.msk.f32.mxu1 %vm4619_vm0, %v4620_v6 }
  0x48   :  { %4482 = vmatpush3.bf16.msra.mxu0 %v4481_v59  ;;  %4488 = vmatpush3.bf16.msra.mxu1 %v4481_v59 }
  0x49   :  { %4489 = vmatprep.subr.bf16.mxu0 %v4618_v3  ;;  %4495 = vmatprep.subr.bf16.mxu1 %v4618_v3 }
  0x4b   :  { %4182 = vmatmul.mubr.msk.f32.vlgmr.msra.gmra.mrb[16].mxu0 %vm58_vm1, %v40_v60  ;;  %4193 = vmatmul.mubr.msk.f32.vlgmr.msra.gmra.mrb[16].mxu1 %vm58_vm1, %v41_v61 }
  0x4c   :  { %4203 = vmatprep.mubr.msk.f32.mxu0 %vm4619_vm0, %v4620_v6  ;;  %4214 = vmatprep.mubr.msk.f32.mxu1 %vm4619_vm0, %v4620_v6 }
  0x4d   :  { %4491 = vmatpush3.bf16.msra.mxu0 %v4490_v0  ;;  %4497 = vmatpush3.bf16.msra.mxu1 %v4490_v0 }
  0x4e   :  { %4492 = vmatprep.subr.bf16.mxu0 %v4618_v3  ;;  %4498 = vmatprep.subr.bf16.mxu1 %v4618_v3 }
  0x51   :  { %4494 = vmatpush3.bf16.msra.mxu0 %v4493_v4  ;;  %4500 = vmatpush3.bf16.msra.mxu1 %v4493_v4 }
  0x52   :  { %4501 = vmatprep.subr.bf16.mxu0 %v4618_v3  ;;  %4507 = vmatprep.subr.bf16.mxu1 %v4618_v3 }
  0x54   :  { %4204 = vmatmul.mubr.msk.f32.vlgmr.msra.gmra.mrb[18].mxu0 %vm58_vm1, %v40_v60  ;;  %4215 = vmatmul.mubr.msk.f32.vlgmr.msra.gmra.mrb[18].mxu1 %vm58_vm1, %v41_v61 }
  0x55   :  { %4503 = vmatpush3.bf16.msra.mxu0 %v4502_v8  ;;  %4509 = vmatpush3.bf16.msra.mxu1 %v4502_v8 }
  0x56   :  { %4504 = vmatprep.subr.bf16.mxu0 %v4618_v3  ;;  %4510 = vmatprep.subr.bf16.mxu1 %v4618_v3 }
  0x57   :  { %4225 = vmatprep.mubr.msk.f32.mxu0 %vm4619_vm0, %v4620_v6  ;;  %4236 = vmatprep.mubr.msk.f32.mxu1 %vm4619_vm0, %v4620_v6 }
  0x59   :  { %4506 = vmatpush3.bf16.msra.mxu0 %v4505_v11  ;;  %4512 = vmatpush3.bf16.msra.mxu1 %v4505_v11  ;;  %v1797_v11 = vld [vmem:[%s5201_s3] sm:$0xff] }
  0x5a   :  { %4513 = vmatprep.subr.bf16.mxu0 %v4618_v3  ;;  %4519 = vmatprep.subr.bf16.mxu1 %v4618_v3  ;;  %vm1799_vm3 = vcmp.gt.f32.partialorder %v1797_v11, 0.5 }
  0x5b   :  { %v1801_v13 = vsel %vm1799_vm3, -1e+09, %v4620_v6 }
  0x5c   :  { %4226 = vmatmul.mubr.msk.f32.vlgmr.msra.gmra.mrb[20].mxu0 %vm58_vm1, %v40_v60  ;;  %4237 = vmatmul.mubr.msk.f32.vlgmr.msra.gmra.mrb[20].mxu1 %vm58_vm1, %v41_v61 }
  0x5d   :  { %4515 = vmatpush3.bf16.msra.mxu0 %v4514_v14  ;;  %4521 = vmatpush3.bf16.msra.mxu1 %v4514_v14 }
  0x5e   :  { %4516 = vmatprep.subr.bf16.mxu0 %v4618_v3  ;;  %4522 = vmatprep.subr.bf16.mxu1 %v4618_v3 }
  0x5f   :  { %4247 = vmatprep.mubr.msk.f32.mxu0 %vm4619_vm0, %v4620_v6  ;;  %4258 = vmatprep.mubr.msk.f32.mxu1 %vm4619_vm0, %v4620_v6 }
  0x61   :  { %4518 = vmatpush3.bf16.msra.mxu0 %v4517_v17  ;;  %4524 = vmatpush3.bf16.msra.mxu1 %v4517_v17 }
  0x62   :  { %4261 = vmatprep.subr.mxu0 %v4620_v6  ;;  %4266 = vmatprep.subr.mxu1 %v4620_v6 }
  0x64   :  { %4248 = vmatmul.mubr.msk.f32.vlgmr.msra.gmra.mrb[22].mxu0 %vm58_vm1, %v40_v60  ;;  %4259 = vmatmul.mubr.msk.f32.vlgmr.msra.gmra.mrb[22].mxu1 %vm58_vm1, %v41_v61 }
  0x65   :  { %4263 = vmatprep.mubr.msk.f32.mxu0 %vm4619_vm0, %v4620_v6  ;;  %4268 = vmatprep.mubr.msk.f32.mxu1 %vm4619_vm0, %v4620_v6 }
  0xde   :  { %v128_v3 = vpop.f32.mrb[0].mxu0  ;;  %v201_v18 = vpop.f32.mrb[0].mxu1 }
  0xdf   :  { %v4007_v19 = vpop.f32.mrb[1].mxu0  ;;  %v4018_v20 = vpop.f32.mrb[1].mxu1  ;;  %v1789_v37 = vmul.f32 0.35355338, %v128_v3  ;;  %v1790_v38 = vmul.f32 0.35355338, %v201_v18 }
  0xe6   :  { %v271_v21 = vpop.f32.mrb[2].mxu0  ;;  %v341_v22 = vpop.f32.mrb[2].mxu1 }
  0xe7   :  { %v4029_v23 = vpop.f32.mrb[3].mxu0  ;;  %v4040_v24 = vpop.f32.mrb[3].mxu1  ;;  %v1791_v43 = vmul.f32 0.35355338, %v271_v21  ;;  %v1792_v44 = vmul.f32 0.35355338, %v341_v22 }
  0xee   :  { %v411_v25 = vpop.f32.mrb[4].mxu0  ;;  %v481_v26 = vpop.f32.mrb[4].mxu1 }
  0xef   :  { %v4051_v27 = vpop.f32.mrb[5].mxu0  ;;  %v4062_v28 = vpop.f32.mrb[5].mxu1  ;;  %v1793_v49 = vmul.f32 0.35355338, %v411_v25  ;;  %v1794_v50 = vmul.f32 0.35355338, %v481_v26 }
  0xf6   :  { %v551_v29 = vpop.f32.mrb[6].mxu0  ;;  %v621_v30 = vpop.f32.mrb[6].mxu1 }
  0xf7   :  { %v4073_v31 = vpop.f32.mrb[7].mxu0  ;;  %v4084_v32 = vpop.f32.mrb[7].mxu1  ;;  %v1795_v55 = vmul.f32 0.35355338, %v551_v29  ;;  %v1796_v56 = vmul.f32 0.35355338, %v621_v30 }
  0xfe   :  { %v710_v33 = vpop.f32.mrb[8].mxu0  ;;  %v783_v34 = vpop.f32.mrb[8].mxu1 }
  0xff   :  { %v4095_v35 = vpop.f32.mrb[9].mxu0  ;;  %v4106_v36 = vpop.f32.mrb[9].mxu1  ;;  %4262 = vmatpush3.xpose.msk.msra.mxu0 %vm1803_vm2, %v710_v33  ;;  %4267 = vmatpush3.xpose.msk.msra.mxu1 %vm1803_vm2, %v783_v34 }
 0x100   :  { %4271 = vmatprep.subr.mxu0 %v4620_v6  ;;  %4276 = vmatprep.subr.mxu1 %v4620_v6 }
 0x102   :  { %4264 = vmatmul.mubr.msk.f32.vlgmr.msra.gmra.mrb[24].mxu0 %vm1803_vm2, %v1789_v37  ;;  %4269 = vmatmul.mubr.msk.f32.vlgmr.msra.gmra.mrb[24].mxu1 %vm1803_vm2, %v1790_v38 }
 0x103   :  { %4273 = vmatprep.mubr.msk.f32.mxu0 %vm4619_vm0, %v4620_v6  ;;  %4278 = vmatprep.mubr.msk.f32.mxu1 %vm4619_vm0, %v4620_v6 }
 0x106   :  { %v853_v39 = vpop.f32.mrb[10].mxu0  ;;  %v923_v40 = vpop.f32.mrb[10].mxu1 }
 0x107   :  { %v4117_v41 = vpop.f32.mrb[11].mxu0  ;;  %v4128_v42 = vpop.f32.mrb[11].mxu1  ;;  %4272 = vmatpush3.xpose.msk.msra.mxu0 %vm1803_vm2, %v853_v39  ;;  %4277 = vmatpush3.xpose.msk.msra.mxu1 %vm1803_vm2, %v923_v40 }
 0x108   :  { %4281 = vmatprep.subr.mxu0 %v4620_v6  ;;  %4286 = vmatprep.subr.mxu1 %v4620_v6 }
 0x10a   :  { %4274 = vmatmul.mubr.msk.f32.vlgmr.msra.gmra.mrb[26].mxu0 %vm1803_vm2, %v1791_v43  ;;  %4279 = vmatmul.mubr.msk.f32.vlgmr.msra.gmra.mrb[26].mxu1 %vm1803_vm2, %v1792_v44 }
 0x10b   :  { %4283 = vmatprep.mubr.msk.f32.mxu0 %vm4619_vm0, %v4620_v6  ;;  %4288 = vmatprep.mubr.msk.f32.mxu1 %vm4619_vm0, %v4620_v6 }
 0x10e   :  { %v993_v45 = vpop.f32.mrb[12].mxu0  ;;  %v1063_v46 = vpop.f32.mrb[12].mxu1 }
 0x10f   :  { %v4139_v47 = vpop.f32.mrb[13].mxu0  ;;  %v4150_v48 = vpop.f32.mrb[13].mxu1  ;;  %4282 = vmatpush3.xpose.msk.msra.mxu0 %vm1803_vm2, %v993_v45  ;;  %4287 = vmatpush3.xpose.msk.msra.mxu1 %vm1803_vm2, %v1063_v46 }
 0x110   :  { %4291 = vmatprep.subr.mxu0 %v4620_v6  ;;  %4296 = vmatprep.subr.mxu1 %v4620_v6 }
 0x112   :  { %4284 = vmatmul.mubr.msk.f32.vlgmr.msra.gmra.mrb[28].mxu0 %vm1803_vm2, %v1793_v49  ;;  %4289 = vmatmul.mubr.msk.f32.vlgmr.msra.gmra.mrb[28].mxu1 %vm1803_vm2, %v1794_v50 }
 0x113   :  { %4293 = vmatprep.mubr.msk.f32.mxu0 %vm4619_vm0, %v4620_v6  ;;  %4298 = vmatprep.mubr.msk.f32.mxu1 %vm4619_vm0, %v4620_v6 }
 0x116   :  { %v1133_v51 = vpop.f32.mrb[14].mxu0  ;;  %v1203_v52 = vpop.f32.mrb[14].mxu1 }
 0x117   :  { %v4161_v53 = vpop.f32.mrb[15].mxu0  ;;  %v4172_v54 = vpop.f32.mrb[15].mxu1  ;;  %4292 = vmatpush3.xpose.msk.msra.mxu0 %vm1803_vm2, %v1133_v51  ;;  %4297 = vmatpush3.xpose.msk.msra.mxu1 %vm1803_vm2, %v1203_v52 }
 0x118   :  { %4301 = vmatprep.subr.mxu0 %v4620_v6  ;;  %4306 = vmatprep.subr.mxu1 %v4620_v6 }
 0x11a   :  { %4294 = vmatmul.mubr.msk.f32.vlgmr.msra.gmra.mrb[30].mxu0 %vm1803_vm2, %v1795_v55  ;;  %4299 = vmatmul.mubr.msk.f32.vlgmr.msra.gmra.mrb[30].mxu1 %vm1803_vm2, %v1796_v56 }
 0x11b   :  { %4303 = vmatprep.mubr.msk.f32.mxu0 %vm4619_vm0, %v4620_v6  ;;  %4308 = vmatprep.mubr.msk.f32.mxu1 %vm4619_vm0, %v4620_v6 }
 0x11e   :  { %v1292_v57 = vpop.f32.mrb[16].mxu0  ;;  %v1365_v58 = vpop.f32.mrb[16].mxu1 }
 0x11f   :  { %v4183_v59 = vpop.f32.mrb[17].mxu0  ;;  %4302 = vmatpush3.msra.mxu0 %v1292_v57  ;;  %v4194_v60 = vpop.f32.mrb[17].mxu1  ;;  %4307 = vmatpush3.msra.mxu1 %v1365_v58 }
 0x120   :  { %4311 = vmatprep.subr.mxu0 %v4620_v6  ;;  %4316 = vmatprep.subr.mxu1 %v4620_v6 }
 0x127   :  { %v5016_v61 = vpop.f32.mrb[18].mxu0  ;;  %v5018_v62 = vpop.f32.mrb[18].mxu1 }
 0x128   :  { %v4205_v63 = vpop.f32.mrb[19].mxu0  ;;  %v4216_v0 = vpop.f32.mrb[19].mxu1 }
 0x12f   :  { %v5020_v1 = vpop.f32.mrb[20].mxu0  ;;  %v5022_v2 = vpop.f32.mrb[20].mxu1 }
 0x130   :  { %v4227_v4 = vpop.f32.mrb[21].mxu0  ;;  %v4238_v5 = vpop.f32.mrb[21].mxu1 }
 0x137   :  { %v5024_v7 = vpop.f32.mrb[22].mxu0  ;;  %v5026_v8 = vpop.f32.mrb[22].mxu1 }
 0x138   :  { %v4249_v9 = vpop.f32.mrb[23].mxu0  ;;  %v4260_v10 = vpop.f32.mrb[23].mxu1 }
 0x1d5   :  { %v1876_v14 = vpop.f32.mrb[24].mxu0  ;;  %v1952_v16 = vpop.f32.mrb[24].mxu1 }
 0x1d6   :  { %v1877_v17 = vadd.f32 %v1876_v14, %v1801_v13  ;;  %v4265_v3 = vpop.f32.mrb[25].mxu0  ;;  %v4270_v18 = vpop.f32.mrb[25].mxu1  ;;  %v1953_v19 = vadd.f32 %v1952_v16, %v1802_v15 }
 0x1d8   :  { %v2412_v20 = vsel %vm1803_vm2, %v1877_v17, -inf  ;;  %v2415_v21 = vsel %vm1803_vm2, %v1953_v19, -inf }
 0x1d9   :  { %2413 = vmax.xlane.f32.xlu0 %v2412_v20 }
 0x1dd   :  { %v2104_v22 = vpop.f32.mrb[26].mxu1  ;;  %2416 = vmax.xlane.f32.xlu0 %v2415_v21  ;;  %v2028_v23 = vpop.f32.mrb[26].mxu0 }
 0x1de   :  { %v2029_v24 = vadd.f32 %v2028_v23, %v1801_v13  ;;  %v4275_v25 = vpop.f32.mrb[27].mxu0  ;;  %v4280_v26 = vpop.f32.mrb[27].mxu1  ;;  %v2105_v27 = vadd.f32 %v2104_v22, %v1802_v15 }
 0x1e0   :  { %v2418_v28 = vsel %vm1803_vm2, %v2029_v24, -inf  ;;  %v2421_v29 = vsel %vm1803_vm2, %v2105_v27, -inf }
 0x1e1   :  { %2419 = vmax.xlane.f32.xlu1 %v2418_v28 }
 0x1e5   :  { %v2256_v30 = vpop.f32.mrb[28].mxu1  ;;  %2422 = vmax.xlane.f32.xlu1 %v2421_v29  ;;  %v2180_v31 = vpop.f32.mrb[28].mxu0 }
 0x1e6   :  { %v2257_v32 = vadd.f32 %v2256_v30, %v1802_v15  ;;  %v2181_v33 = vadd.f32 %v2180_v31, %v1801_v13  ;;  %v4285_v34 = vpop.f32.mrb[29].mxu0  ;;  %v4290_v35 = vpop.f32.mrb[29].mxu1 }
 0x1e8   :  { %v2427_v36 = vsel %vm1803_vm2, %v2257_v32, -inf  ;;  %v2424_v37 = vsel %vm1803_vm2, %v2181_v33, -inf }
 0x1e9   :  { %2428 = vmax.xlane.f32.xlu1 %v2427_v36  ;;  %2425 = vmax.xlane.f32.xlu0 %v2424_v37 }
 0x1ed   :  { %v2332_v38 = vpop.f32.mrb[30].mxu0  ;;  %v2408_v39 = vpop.f32.mrb[30].mxu1 }
 0x1ee   :  { %v2333_v40 = vadd.f32 %v2332_v38, %v1801_v13  ;;  %v2409_v41 = vadd.f32 %v2408_v39, %v1802_v15  ;;  %v4295_v42 = vpop.f32.mrb[31].mxu0  ;;  %v4300_v43 = vpop.f32.mrb[31].mxu1 }
 0x1f0   :  { %v2433_v44 = vsel %vm1803_vm2, %v2409_v41, -inf  ;;  %v2430_v45 = vsel %vm1803_vm2, %v2333_v40, -inf }
 0x1f1   :  { %2434 = vmax.xlane.f32.xlu1 %v2433_v44  ;;  %2431 = vmax.xlane.f32.xlu0 %v2430_v45 }
 0x266   :  { %v2414_v46 = vpop.xlane.xlu0 %2413 }
 0x267   :  { %v2436_v47 = vsub.f32 %v1877_v17, %v2414_v46 }
 0x269   :  { %v2444_v48 = vmul.f32 1.442695, %v2436_v47 }
 0x26a   :  { %v2417_v49 = vpop.xlane.xlu0 %2416 }
 0x26b   :  { %4532 = vpow2.f32 %v2444_v48  ;;  %v2437_v50 = vsub.f32 %v1953_v19, %v2417_v49 }
 0x26d   :  { %v2446_v51 = vmul.f32 1.442695, %v2437_v50 }
 0x26e   :  { %v2420_v52 = vpop.xlane.xlu1 %2419 }
 0x26f   :  { %4534 = vpow2.f32 %v2446_v51  ;;  %v2438_v53 = vsub.f32 %v2029_v24, %v2420_v52 }
 0x271   :  { %v2448_v54 = vmul.f32 1.442695, %v2438_v53  ;;  %v3094_v53 = vld [vmem:[%s5205_s7 + $0x10] sm:$0xff] }
 0x272   :  { %v2423_v55 = vpop.xlane.xlu1 %2422 }
 0x273   :  { %4536 = vpow2.f32 %v2448_v54  ;;  %v2439_v56 = vsub.f32 %v2105_v27, %v2423_v55 }
 0x275   :  { %v4533_v57 = vpop.eup %4532  ;;  %v2450_v58 = vmul.f32 1.442695, %v2439_v56 }
 0x276   :  { %v2429_v59 = vpop.xlane.xlu1 %2428  ;;  %v2426_v60 = vpop.xlane.xlu0 %2425  ;;  %v2460_v63 = vsel %vm1803_vm2, %v4533_v57, 0.0 }
 0x277   :  { %4538 = vpow2.f32 %v2450_v58  ;;  %v2441_v0 = vsub.f32 %v2257_v32, %v2429_v59  ;;  %v2440_v4 = vsub.f32 %v2181_v33, %v2426_v60  ;;  %2461 = vadd.xlane.f32.xlu0 %v2460_v63  ;;  %v3095_v58 = vld [vmem:[%s5205_s7 + $0x18] sm:$0xff] }
 0x279   :  { %v4535_v5 = vpop.eup %4534  ;;  %v2454_v9 = vmul.f32 1.442695, %v2441_v0  ;;  %v2452_v10 = vmul.f32 1.442695, %v2440_v4 }
 0x27a   :  { %v2463_v11 = vsel %vm1803_vm2, %v4535_v5, 0.0 }
 0x27b   :  { %4540 = vpow2.f32 %v2454_v9  ;;  %2464 = vadd.xlane.f32.xlu1 %v2463_v11 }
 0x27c   :  { %4542 = vpow2.f32 %v2452_v10 }
 0x27d   :  { %v4537_v12 = vpop.eup %4536 }
 0x27e   :  { %v2435_v13 = vpop.xlane.xlu1 %2434  ;;  %v2432_v14 = vpop.xlane.xlu0 %2431  ;;  %v2466_v15 = vsel %vm1803_vm2, %v4537_v12, 0.0 }
 0x27f   :  { %v2443_v16 = vsub.f32 %v2409_v41, %v2435_v13  ;;  %v2442_v17 = vsub.f32 %v2333_v40, %v2432_v14  ;;  %2467 = vadd.xlane.f32.xlu0 %v2466_v15 }
 0x281   :  { %v4539_v3 = vpop.eup %4538  ;;  %v2458_v18 = vmul.f32 1.442695, %v2443_v16  ;;  %v2456_v19 = vmul.f32 1.442695, %v2442_v17 }
 0x282   :  { %v2469_v20 = vsel %vm1803_vm2, %v4539_v3, 0.0 }
 0x283   :  { %4544 = vpow2.f32 %v2458_v18  ;;  %2470 = vadd.xlane.f32.xlu1 %v2469_v20 }
 0x284   :  { %4546 = vpow2.f32 %v2456_v19 }
 0x285   :  { %v4541_v21 = vpop.eup %4540 }
 0x286   :  { %v4543_v22 = vpop.eup %4542  ;;  %v2475_v23 = vsel %vm1803_vm2, %v4541_v21, 0.0 }
 0x287   :  { %2476 = vadd.xlane.f32.xlu1 %v2475_v23  ;;  %v2472_v24 = vsel %vm1803_vm2, %v4543_v22, 0.0 }
 0x288   :  { %2473 = vadd.xlane.f32.xlu0 %v2472_v24 }
 0x28d   :  { %v5050_v25 = vpop.eup %4544 }
 0x28e   :  { %v5052_v26 = vpop.eup %4546  ;;  %v2481_v27 = vsel %vm1803_vm2, %v5050_v25, 0.0 }
 0x28f   :  { %2482 = vadd.xlane.f32.xlu1 %v2481_v27  ;;  %v2478_v28 = vsel %vm1803_vm2, %v5052_v26, 0.0 }
 0x290   :  { %2479 = vadd.xlane.f32.xlu0 %v2478_v28 }
 0x304   :  { %v2462_v29 = vpop.xlane.xlu0 %2461 }
 0x305   :  { %4548 = vrcp.f32 %v2462_v29 }
 0x308   :  { %v2465_v30 = vpop.xlane.xlu1 %2464 }
 0x309   :  { %4550 = vrcp.f32 %v2465_v30 }
 0x30c   :  { %v2468_v31 = vpop.xlane.xlu0 %2467 }
 0x30d   :  { %4552 = vrcp.f32 %v2468_v31 }
 0x30f   :  { %v4549_v32 = vpop.eup %4548 }
 0x310   :  { %v2492_v33 = vmul.f32 %v4549_v32, %v4533_v57  ;;  %v2471_v34 = vpop.xlane.xlu1 %2470 }
 0x311   :  { %4554 = vrcp.f32 %v2471_v34 }
 0x312   :  { %2500 = vst.msk [vmem:[#allocation4] sm:$0xff] %vm1803_vm2, %v2492_v33  ;;  %4304 = vmatmul.mubr.msk.f32.vlgmr.msra.gmra.mrb[32].mxu0 %vm1803_vm2, %v2492_v33 }
 0x313   :  { %v4551_v35 = vpop.eup %4550  ;;  %4312 = vmatpush3.msra.mxu0 %v5016_v61  ;;  %4313 = vmatprep.mubr.msk.f32.mxu0 %vm4619_vm0, %v4620_v6 }
 0x314   :  { %v2493_v36 = vmul.f32 %v4551_v35, %v4535_v5  ;;  %v2477_v37 = vpop.xlane.xlu1 %2476  ;;  %4321 = vmatprep.subr.mxu0 %v4620_v6 }
 0x315   :  { %4556 = vrcp.f32 %v2477_v37  ;;  %v2474_v38 = vpop.xlane.xlu0 %2473 }
 0x316   :  { %2501 = vst.msk [vmem:[#allocation4 + $0x8] sm:$0xff] %vm1803_vm2, %v2493_v36  ;;  %4558 = vrcp.f32 %v2474_v38  ;;  %4309 = vmatmul.mubr.msk.f32.vlgmr.msra.gmra.mrb[32].mxu1 %vm1803_vm2, %v2493_v36 }
 0x317   :  { %v4553_v39 = vpop.eup %4552  ;;  %4317 = vmatpush3.msra.mxu1 %v5018_v62  ;;  %4318 = vmatprep.mubr.msk.f32.mxu1 %vm4619_vm0, %v4620_v6 }
 0x318   :  { %v2494_v61 = vmul.f32 %v4553_v39, %v4537_v12  ;;  %4326 = vmatprep.subr.mxu1 %v4620_v6  ;;  %v4568_v39 = vld [vmem:[%s5198_s0 + $0x8] sm:$0xff] }
 0x31a   :  { %2502 = vst.msk [vmem:[#allocation4 + $0x10] sm:$0xff] %vm1803_vm2, %v2494_v61  ;;  %4314 = vmatmul.mubr.msk.f32.vlgmr.msra.gmra.mrb[34].mxu0 %vm1803_vm2, %v2494_v61 }
 0x31b   :  { %v4555_v40 = vpop.eup %4554  ;;  %4322 = vmatpush3.msra.mxu0 %v5020_v1  ;;  %4323 = vmatprep.mubr.msk.f32.mxu0 %vm4619_vm0, %v4620_v6 }
 0x31c   :  { %v2495_v41 = vmul.f32 %v4555_v40, %v4539_v3  ;;  %v2483_v42 = vpop.xlane.xlu1 %2482  ;;  %4331 = vmatprep.subr.mxu0 %v4620_v6  ;;  %v4569_v40 = vld [vmem:[%s5198_s0] sm:$0xff]  ;;  %s4621_s0 = smov [#allocation4]  }
 0x31d   :  { %4560 = vrcp.f32 %v2483_v42  ;;  %v2480_v62 = vpop.xlane.xlu0 %2479  ;;  %s3756_s23 = sshll.u32 %s4621_s0, 4  ;;  %s3757_s23 = int_to_ptr.vmem [resolvable:$true] %s3756_s23 }
 0x31e   :  { %2503 = vst.msk [vmem:[#allocation4 + $0x18] sm:$0xff] %vm1803_vm2, %v2495_v41  ;;  %4562 = vrcp.f32 %v2480_v62  ;;  %4319 = vmatmul.mubr.msk.f32.vlgmr.msra.gmra.mrb[34].mxu1 %vm1803_vm2, %v2495_v41  ;;  %s4570_s24 = scalar_lea.vmem %s3757_s23, 1024  ;;  %p4575_p1 = scmp.lt.s32.totalorder %s3757_s23, %s3757_s23 }
 0x31f   :  { %v4557_v43 = vpop.eup %4556  ;;  %4327 = vmatpush3.msra.mxu1 %v5022_v2  ;;  %4328 = vmatprep.mubr.msk.f32.mxu1 %vm4619_vm0, %v4620_v6  ;;  %p4571_p0 = scmp.ne.s32.totalorder %s3757_s23, %s4570_s24  ;;  %p4576_p2 = scmp.lt.s32.totalorder %s4570_s24, %s4570_s24 }
 0x320   :  { %v4559_v1 = vpop.eup %4558  ;;  %v2497_v44 = vmul.f32 %v4557_v43, %v4541_v21  ;;  %4336 = vmatprep.subr.mxu1 %v4620_v6 }
 0x321   :  { %v2496_v45 = vmul.f32 %v4559_v1, %v4543_v22  ;;  %p4577_p3 = por %p4576_p2, %p4575_p1 }
 0x322   :  { %2505 = vst.msk [vmem:[#allocation4 + $0x28] sm:$0xff] %vm1803_vm2, %v2497_v44  ;;  %4329 = vmatmul.mubr.msk.f32.vlgmr.msra.gmra.mrb[36].mxu1 %vm1803_vm2, %v2497_v44 }
 0x323   :  { %2504 = vst.msk [vmem:[#allocation4 + $0x20] sm:$0xff] %vm1803_vm2, %v2496_v45  ;;  %4324 = vmatmul.mubr.msk.f32.vlgmr.msra.gmra.mrb[36].mxu0 %vm1803_vm2, %v2496_v45  ;;  %4337 = vmatpush3.msra.mxu1 %v5026_v8  ;;  %v3093_v8 = vld [vmem:[%s5205_s7 + $0x8] sm:$0xff]  ;;  %p4578_p4 = pnand %p4577_p3, %p4571_p0 }
 0x324   :  { %4332 = vmatpush3.msra.mxu0 %v5024_v7  ;;  %4333 = vmatprep.mubr.msk.f32.mxu0 %vm4619_vm0, %v4620_v6  ;;  %v3092_v7 = vld [vmem:[%s5205_s7] sm:$0xff] }
 0x325   :  { %4338 = vmatprep.mubr.msk.f32.mxu1 %vm4619_vm0, %v4620_v6  ;;  %4341 = vmatprep.subr.mxu0 %v4620_v6 }
 0x326   :  { %4346 = vmatprep.subr.mxu1 %v4620_v6 }
 0x327   :  { %v4561_v2 = vpop.eup %4560 }
 0x328   :  { %v4563_v46 = vpop.eup %4562  ;;  %v2499_v47 = vmul.f32 %v4561_v2, %v5050_v25 }
 0x329   :  { %v2498_v48 = vmul.f32 %v4563_v46, %v5052_v26 }
 0x32a   :  { %2507 = vst.msk [vmem:[#allocation4 + $0x38] sm:$0xff] %vm1803_vm2, %v2499_v47  ;;  %4339 = vmatmul.mubr.msk.f32.vlgmr.msra.gmra.mrb[38].mxu1 %vm1803_vm2, %v2499_v47 }
 0x32b   :  { %2506 = vst.msk [vmem:[#allocation4 + $0x30] sm:$0xff] %vm1803_vm2, %v2498_v48  ;;  %4334 = vmatmul.mubr.msk.f32.vlgmr.msra.gmra.mrb[38].mxu0 %vm1803_vm2, %v2498_v48  ;;  %4348 = vmatprep.mubr.msk.f32.mxu1 %vm4619_vm0, %v4620_v6 }
 0x32c   :  { %4343 = vmatprep.mubr.msk.f32.mxu0 %vm4619_vm0, %v4620_v6  ;;  %4342 = vmatpush3.msra.mxu0 %v3092_v7 }
 0x32d   :  { %4347 = vmatpush3.msra.mxu1 %v3092_v7  ;;  %4351 = vmatprep.subr.mxu0 %v4620_v6 }
 0x32e   :  { %4356 = vmatprep.subr.mxu1 %v4620_v6 }
 0x3e5   :  { %v2577_v49 = vpop.f32.mrb[32].mxu0 }
 0x3e6   :  { %v4305_v50 = vpop.f32.mrb[33].mxu0  ;;  %4344 = vmatmul.mubr.msk.f32.vlgmr.msra.gmra.mrb[40].mxu0 %vm1803_vm2, %v2577_v49 }
 0x3e7   :  { %4352 = vmatpush3.msra.mxu0 %v3093_v8  ;;  %4353 = vmatprep.mubr.msk.f32.mxu0 %vm4619_vm0, %v4620_v6 }
 0x3e8   :  { %4361 = vmatprep.subr.mxu0 %v4620_v6 }
 0x3e9   :  { %v2650_v51 = vpop.f32.mrb[32].mxu1 }
 0x3ea   :  { %v4310_v52 = vpop.f32.mrb[33].mxu1  ;;  %4349 = vmatmul.mubr.msk.f32.vlgmr.msra.gmra.mrb[40].mxu1 %vm1803_vm2, %v2650_v51 }
 0x3eb   :  { %4357 = vmatpush3.msra.mxu1 %v3093_v8  ;;  %4358 = vmatprep.mubr.msk.f32.mxu1 %vm4619_vm0, %v4620_v6 }
 0x3ec   :  { %4366 = vmatprep.subr.mxu1 %v4620_v6 }
 0x3ed   :  { %v2723_v54 = vpop.f32.mrb[34].mxu0 }
 0x3ee   :  { %v4315_v55 = vpop.f32.mrb[35].mxu0  ;;  %4354 = vmatmul.mubr.msk.f32.vlgmr.msra.gmra.mrb[42].mxu0 %vm1803_vm2, %v2723_v54 }
 0x3ef   :  { %4362 = vmatpush3.msra.mxu0 %v3094_v53  ;;  %4363 = vmatprep.mubr.msk.f32.mxu0 %vm4619_vm0, %v4620_v6 }
 0x3f0   :  { %4371 = vmatprep.subr.mxu0 %v4620_v6 }
 0x3f1   :  { %v2796_v56 = vpop.f32.mrb[34].mxu1 }
 0x3f2   :  { %v4320_v57 = vpop.f32.mrb[35].mxu1  ;;  %4359 = vmatmul.mubr.msk.f32.vlgmr.msra.gmra.mrb[42].mxu1 %vm1803_vm2, %v2796_v56 }
 0x3f3   :  { %4367 = vmatpush3.msra.mxu1 %v3094_v53  ;;  %4368 = vmatprep.mubr.msk.f32.mxu1 %vm4619_vm0, %v4620_v6 }
 0x3f4   :  { %4376 = vmatprep.subr.mxu1 %v4620_v6 }
 0x3f5   :  { %v2942_v59 = vpop.f32.mrb[36].mxu1 }
 0x3f6   :  { %v2869_v60 = vpop.f32.mrb[36].mxu0  ;;  %v4330_v63 = vpop.f32.mrb[37].mxu1  ;;  %4369 = vmatmul.mubr.msk.f32.vlgmr.msra.gmra.mrb[44].mxu1 %vm1803_vm2, %v2942_v59 }
 0x3f7   :  { %v4325_v0 = vpop.f32.mrb[37].mxu0  ;;  %4364 = vmatmul.mubr.msk.f32.vlgmr.msra.gmra.mrb[44].mxu0 %vm1803_vm2, %v2869_v60  ;;  %4377 = vmatpush3.msra.mxu1 %v3095_v58 }
 0x3f8   :  { %4372 = vmatpush3.msra.mxu0 %v3095_v58  ;;  %4373 = vmatprep.mubr.msk.f32.mxu0 %vm4619_vm0, %v4620_v6 }
 0x3f9   :  { %4378 = vmatprep.mubr.msk.f32.mxu1 %vm4619_vm0, %v4620_v6 }
 0x3fd   :  { %v3088_v4 = vpop.f32.mrb[38].mxu1 }
 0x3fe   :  { %v3015_v5 = vpop.f32.mrb[38].mxu0  ;;  %v4340_v9 = vpop.f32.mrb[39].mxu1  ;;  %4379 = vmatmul.mubr.msk.f32.vlgmr.msra.gmra.mrb[46].mxu1 %vm1803_vm2, %v3088_v4 }
 0x3ff   :  { %v4335_v10 = vpop.f32.mrb[39].mxu0  ;;  %4374 = vmatmul.mubr.msk.f32.vlgmr.msra.gmra.mrb[46].mxu0 %vm1803_vm2, %v3015_v5 }
 0x4b9   :  { %v3165_v11 = vpop.f32.mrb[40].mxu0 }
 0x4ba   :  { %v4345_v12 = vpop.f32.mrb[41].mxu0  ;;  %v3680_v16 = vsel %vm58_vm1, %v3165_v11, 0.0 }
 0x4bd   :  { %v3238_v13 = vpop.f32.mrb[40].mxu1 }
 0x4be   :  { %v4350_v14 = vpop.f32.mrb[41].mxu1  ;;  %v3687_v19 = vsel %vm58_vm1, %v3238_v13, 0.0 }
 0x4c1   :  { %v3311_v15 = vpop.f32.mrb[42].mxu0 }
 0x4c2   :  { %v3681_v17 = vsel %vm58_vm1, %v3311_v15, 0.0  ;;  %v4355_v3 = vpop.f32.mrb[43].mxu0 }
 0x4c3   :  { %v3682_v18 = vadd.f32 %v3681_v17, %v3680_v16 }
 0x4c5   :  { %v3384_v6 = vpop.f32.mrb[42].mxu1 }
 0x4c6   :  { %v3688_v20 = vsel %vm58_vm1, %v3384_v6, 0.0  ;;  %v4360_v21 = vpop.f32.mrb[43].mxu1 }
 0x4c7   :  { %v3689_v22 = vadd.f32 %v3688_v20, %v3687_v19 }
 0x4c9   :  { %v3530_v23 = vpop.f32.mrb[44].mxu1 }
 0x4ca   :  { %v3457_v24 = vpop.f32.mrb[44].mxu0  ;;  %v3690_v25 = vsel %vm58_vm1, %v3530_v23, 0.0  ;;  %v4370_v26 = vpop.f32.mrb[45].mxu1 }
 0x4cb   :  { %v3683_v27 = vsel %vm58_vm1, %v3457_v24, 0.0  ;;  %v3691_v28 = vadd.f32 %v3690_v25, %v3689_v22  ;;  %v4365_v29 = vpop.f32.mrb[45].mxu0 }
 0x4cc   :  { %v3684_v30 = vadd.f32 %v3683_v27, %v3682_v18 }
 0x4d1   :  { %v3676_v31 = vpop.f32.mrb[46].mxu1 }
 0x4d2   :  { %v3603_v32 = vpop.f32.mrb[46].mxu0  ;;  %v3692_v33 = vsel %vm58_vm1, %v3676_v31, 0.0  ;;  %v4380_v34 = vpop.f32.mrb[47].mxu1 }
 0x4d3   :  { %v3685_v35 = vsel %vm58_vm1, %v3603_v32, 0.0  ;;  %v3693_v36 = vadd.f32 %v3692_v33, %v3691_v28  ;;  %v4375_v37 = vpop.f32.mrb[47].mxu0 }
 0x4d4   :  { %v3686_v38 = vadd.f32 %v3685_v35, %v3684_v30 }
 0x4d5   :  { %v3695_v61 = vadd.f32 %v4568_v39, %v3693_v36 }
 0x4d6   :  { %v3694_v41 = vadd.f32 %v4569_v40, %v3686_v38 }
 0x4d7   :  { %v3699_v42 = vsel %vm58_vm1, %v3695_v61, 0.0 }
 0x4d8   :  { %3700 = vadd.xlane.f32.xlu1 %v3699_v42  ;;  %v3696_v62 = vsel %vm58_vm1, %v3694_v41, 0.0 }
 0x4d9   :  { %3697 = vadd.xlane.f32.xlu0 %v3696_v62 }
 0x565   :  { %v3701_v43 = vpop.xlane.xlu1 %3700 }
 0x566   :  { %v3704_v1 = vmul.f32 0.03125, %v3701_v43  ;;  %v3698_v44 = vpop.xlane.xlu0 %3697 }
 0x567   :  { %v3703_v45 = vmul.f32 0.03125, %v3698_v44 }
 0x568   :  { %v3706_v2 = vsub.f32 %v3695_v61, %v3704_v1 }
 0x569   :  { %v3705_v46 = vsub.f32 %v3694_v41, %v3703_v45 }
 0x56a   :  { %v3708_v47 = vmul.f32 %v3706_v2, %v3706_v2 }
 0x56b   :  { %v3707_v48 = vmul.f32 %v3705_v46, %v3705_v46 }
 0x56c   :  { %v3712_v7 = vsel %vm58_vm1, %v3708_v47, 0.0 }
 0x56d   :  { %3713 = vadd.xlane.f32.xlu1 %v3712_v7  ;;  %v3709_v8 = vsel %vm58_vm1, %v3707_v48, 0.0 }
 0x56e   :  { %3710 = vadd.xlane.f32.xlu0 %v3709_v8 }
 0x56f   :  { %4581 = shalt.err (!%p4578_p4)
}
 0x570   :  { %s4582_s26 = scalar_lea.hbm %s5208_s10, 1024 }
 0x571   :  { %p4583_p5 = scmp.ne.s32.totalorder %s5208_s10, %s4582_s26  ;;  %p4586_p6 = scmp.lt.u32.totalorder %s4582_s26, %s5208_s10 }
 0x573   :  { %p4588_p7 = pnand %p4586_p6, %p4583_p5 }
 0x575   :  { %4591 = shalt.err (!%p4588_p7)
}
 0x576   :  { %s4622_s30 = smov 128   ;;  %s4623_s11 = smov 8   ;;  %v3827_v56 = vld [vmem:[%s5206_s8] ss:$0 sm:$0xff]  ;;  %v3828_v60 = vld [vmem:[%s5206_s8 + $0x1] ss:$0 sm:$0xff] }
 0x577   :  { %3762 = dma.vmem_to_hbm [thread:$0]  %s3757_s23, 1024, %s5208_s10, [#allocation5], %s4622_s30, %s4622_s30, %s4623_s11  }
 0x578   :  { %s4624_s10 = smov [#allocation2]  }
 0x579   :  { %s3744_s2 = sshll.u32 %s4624_s10, 4  ;;  %s3745_s2 = int_to_ptr.vmem [resolvable:$true] %s3744_s2 }
 0x57a   :  { %s4592_s15 = scalar_lea.vmem %s3745_s2, 256  ;;  %p4597_p9 = scmp.lt.s32.totalorder %s3745_s2, %s3745_s2 }
 0x57b   :  { %p4593_p8 = scmp.ne.s32.totalorder %s3745_s2, %s4592_s15  ;;  %p4598_p10 = scmp.lt.s32.totalorder %s4592_s15, %s4592_s15 }
 0x57d   :  { %p4599_p11 = por %p4598_p10, %p4597_p9 }
 0x57f   :  { %p4600_p12 = pnand %p4599_p11, %p4593_p8 }
 0x5fa   :  { %v3714_v49 = vpop.xlane.xlu1 %3713 }
 0x5fb   :  { %v3716_v50 = vmul.f32 0.03125, %v3714_v49  ;;  %v3711_v51 = vpop.xlane.xlu0 %3710 }
 0x5fc   :  { %v3715_v52 = vmul.f32 0.03125, %v3711_v51 }
 0x5fd   :  { %v3718_v53 = vadd.f32 1e-05, %v3716_v50 }
 0x5fe   :  { %v3717_v54 = vadd.f32 1e-05, %v3715_v52 }
 0x5ff   :  { %4564 = vrsqrt.f32 %v3718_v53 }
 0x600   :  { %4566 = vrsqrt.f32 %v3717_v54 }
 0x609   :  { %v4565_v55 = vpop.eup %4564 }
 0x60a   :  { %v4567_v57 = vpop.eup %4566  ;;  %v3722_v58 = vmul.f32 %v4565_v55, %v3706_v2 }
 0x60b   :  { %v3721_v59 = vmul.f32 %v4567_v57, %v3705_v46 }
 0x60c   :  { %v3730_v63 = vmul.f32 %v3827_v56, %v3722_v58 }
 0x60d   :  { %v3729_v0 = vmul.f32 %v3827_v56, %v3721_v59 }
 0x60e   :  { %v3736_v4 = vadd.f32 %v3828_v60, %v3730_v63 }
 0x60f   :  { %v3735_v5 = vadd.f32 %v3828_v60, %v3729_v0 }
 0x610   :  { %3738 = vst.msk [vmem:[#allocation2 + $0x8] sm:$0xff] %vm58_vm1, %v3736_v4 }
 0x611   :  { %3737 = vst.msk [vmem:[#allocation2] sm:$0xff] %vm58_vm1, %v3735_v5 }
 0x612   :  { %4603 = shalt.err (!%p4600_p12)
}
 0x613   :  { %s4604_s17 = scalar_lea.hbm %s5207_s9, 256 }
 0x614   :  { %p4605_p13 = scmp.ne.s32.totalorder %s5207_s9, %s4604_s17  ;;  %p4608_p0 = scmp.lt.u32.totalorder %s4604_s17, %s5207_s9 }
 0x616   :  { %p4610_p1 = pnand %p4608_p0, %p4605_p13 }
 0x618   :  { %4613 = shalt.err (!%p4610_p1)
}
 0x619   :  { %3750 = dma.vmem_to_hbm [thread:$0]  %s3745_s2, 256, %s5207_s9, [#allocation3], %s4622_s30, %s4622_s30, %s4623_s11  }
 0x61a   :  { %4614 = dma.done.wait [#allocation3], 256  }
 0x61b   :  { %4615 = vsyncadd [#allocation3], 4294967040 }
 0x61c   :  { %4616 = dma.done.wait [#allocation5], 1024  }
 0x61d   :  { %4617 = vsyncadd [#allocation5], 4294966272 }
 0x61e   :  { %3769 = vsyncpa [#allocation3], 1 }
 0x61f   :  { %3770 = vsyncpa [#allocation5], 1 }

</bundles_post_ra>
